<compile_context>
chip_gen: v5e
topology: v5e:2x2
jax: 0.10.0
libtpu: 0.0.40
codegen_flags: <defaults>
</compile_context>

<pallas_src>
import math
from functools import partial

import jax
import jax.numpy as jnp
from jax import lax
from jax.experimental import pallas as pl
from jax.experimental.pallas import tpu as pltpu


def _mha_kernel(q_ref, k_ref, v_ref, mask_ref,
                wq_ref, wk_ref, wv_ref, wo_ref,
                o_ref, acc_ref, *, scale):
    hh = pl.program_id(1)

    @pl.when(hh == 0)
    def _():
        acc_ref[...] = jnp.zeros_like(acc_ref)

    q = q_ref[0]          # (S, D)
    k = k_ref[0]          # (S, D)
    v = v_ref[0]          # (S, D)
    wq = wq_ref[0]        # (D, d_k)  -- this head's slice of W_q
    wk = wk_ref[0]        # (D, d_k)
    wv = wv_ref[0]        # (D, d_k)
    wo = wo_ref[0]        # (d_k, D)  -- this head's slice of W_o

    # Per-head projections (MXU, f32 accumulation).
    qh = jnp.dot(q, wq, preferred_element_type=jnp.float32)   # (S, d_k)
    kh = jnp.dot(k, wk, preferred_element_type=jnp.float32)   # (S, d_k)
    vh = jnp.dot(v, wv, preferred_element_type=jnp.float32)   # (S, d_k)

    # scores = qh @ kh^T / sqrt(d_k): contract the d_k axes directly
    # (no transposed copy materialized).
    scores = lax.dot_general(
        qh, kh, (((1,), (1,)), ((), ())),
        preferred_element_type=jnp.float32) * scale            # (S, S)

    mask = mask_ref[0]                                         # (S, S)
    scores = jnp.where(mask == 0, jnp.float32(-1e9), scores)

    # Numerically stable softmax over the key axis (matches torch.softmax).
    m = jnp.max(scores, axis=-1, keepdims=True)
    p = jnp.exp(scores - m)
    p = p / jnp.sum(p, axis=-1, keepdims=True)

    ctx = jnp.dot(p, vh, preferred_element_type=jnp.float32)   # (S, d_k)

    # Fused output projection: accumulate this head's contribution.
    acc_ref[...] += jnp.dot(ctx, wo, preferred_element_type=jnp.float32)

    @pl.when(hh == pl.num_programs(1) - 1)
    def _():
        o_ref[...] = acc_ref[...][None].astype(o_ref.dtype)


def multi_head_attention(q, k, v, mask, w_q, w_k, w_v, w_o, *, num_heads):
    """q/k/v: (B, S, D); mask: (B, S, S) (1 = keep, 0 = masked) or None.

    w_q/w_k/w_v/w_o: (D, D) in "x @ W" layout (transpose of nn.Linear.weight).
    """
    B, S, D = q.shape
    assert D % num_heads == 0, "d_model is not divisible by h"
    d_k = D // num_heads
    scale = 1.0 / math.sqrt(d_k)

    if mask is None:
        mask = jnp.ones((B, S, S), dtype=jnp.float32)
    mask = mask.astype(jnp.float32)

    # Per-head weight slabs (cheap, one-time plain-JAX reshapes outside the kernel).
    wq_h = w_q.reshape(D, num_heads, d_k).transpose(1, 0, 2)   # (h, D, d_k)
    wk_h = w_k.reshape(D, num_heads, d_k).transpose(1, 0, 2)   # (h, D, d_k)
    wv_h = w_v.reshape(D, num_heads, d_k).transpose(1, 0, 2)   # (h, D, d_k)
    wo_h = w_o.reshape(num_heads, d_k, D)                      # (h, d_k, D)

    kernel = partial(_mha_kernel, scale=scale)

    return pl.pallas_call(
        kernel,
        out_shape=jax.ShapeDtypeStruct((B, S, D), q.dtype),
        grid_spec=pltpu.PrefetchScalarGridSpec(
            num_scalar_prefetch=0,
            grid=(B, num_heads),
            in_specs=[
                # q/k/v/mask: same block across the head axis -> fetched once per batch.
                pl.BlockSpec((1, S, D), lambda b, hh: (b, 0, 0)),
                pl.BlockSpec((1, S, D), lambda b, hh: (b, 0, 0)),
                pl.BlockSpec((1, S, D), lambda b, hh: (b, 0, 0)),
                pl.BlockSpec((1, S, S), lambda b, hh: (b, 0, 0)),
                # Per-head weight slabs.
                pl.BlockSpec((1, D, d_k), lambda b, hh: (hh, 0, 0)),
                pl.BlockSpec((1, D, d_k), lambda b, hh: (hh, 0, 0)),
                pl.BlockSpec((1, D, d_k), lambda b, hh: (hh, 0, 0)),
                pl.BlockSpec((1, d_k, D), lambda b, hh: (hh, 0, 0)),
            ],
            out_specs=pl.BlockSpec((1, S, D), lambda b, hh: (b, 0, 0)),
            scratch_shapes=[pltpu.VMEM((S, D), jnp.float32)],
        ),
        compiler_params=pltpu.CompilerParams(
            dimension_semantics=("parallel", "arbitrary"),
        ),
    )(q, k, v, mask, wq_h, wk_h, wv_h, wo_h)


if __name__ == "__main__":
    B, S, d_model, h = 2, 8, 32, 4
    d_k = d_model // h

    key = jax.random.PRNGKey(0)
    kq, kk, kv, kwq, kwk, kwv, kwo = jax.random.split(key, 7)
    q = jax.random.normal(kq, (B, S, d_model), dtype=jnp.float32)
    k = jax.random.normal(kk, (B, S, d_model), dtype=jnp.float32)
    v = jax.random.normal(kv, (B, S, d_model), dtype=jnp.float32)

    w_init = 1.0 / math.sqrt(d_model)
    w_q = jax.random.normal(kwq, (d_model, d_model), jnp.float32) * w_init
    w_k = jax.random.normal(kwk, (d_model, d_model), jnp.float32) * w_init
    w_v = jax.random.normal(kwv, (d_model, d_model), jnp.float32) * w_init
    w_o = jax.random.normal(kwo, (d_model, d_model), jnp.float32) * w_init

    # Causal mask (1 = keep, 0 = masked), exercising masked_fill_(mask == 0, -1e9).
    mask = jnp.tril(jnp.ones((S, S), jnp.float32))[None].repeat(B, axis=0)

    out = multi_head_attention(q, k, v, mask, w_q, w_k, w_v, w_o, num_heads=h)
    out = jax.block_until_ready(out)

    # Pure-JAX reference (same math as the PyTorch forward).
    Q = (q @ w_q).reshape(B, S, h, d_k).transpose(0, 2, 1, 3)   # (B, h, S, d_k)
    K = (k @ w_k).reshape(B, S, h, d_k).transpose(0, 2, 1, 3)
    V = (v @ w_v).reshape(B, S, h, d_k).transpose(0, 2, 1, 3)
    scores = jnp.einsum("bhqd,bhkd->bhqk", Q, K) / math.sqrt(d_k)
    scores = jnp.where(mask[:, None] == 0, -1e9, scores)
    attn = jax.nn.softmax(scores, axis=-1)
    ctx = jnp.einsum("bhqk,bhkd->bhqd", attn, V)
    ctx = ctx.transpose(0, 2, 1, 3).reshape(B, S, d_model)
    ref = ctx @ w_o

    assert out.shape == (B, S, d_model)
    max_err = float(jnp.max(jnp.abs(out - ref)))
    assert jnp.allclose(out, ref, atol=2e-2, rtol=2e-2), f"mismatch, max abs err {max_err}"

    print("KERNEL_OK")
</pallas_src>

<mosaic_0001>
module attributes {stable_mosaic.version = 11 : i64} {
  func.func @_mha_kernel(%arg0: i32, %arg1: i32, %arg2: memref<1x8x32xf32, #tpu.memory_space<vmem>>, %arg3: memref<1x8x32xf32, #tpu.memory_space<vmem>>, %arg4: memref<1x8x32xf32, #tpu.memory_space<vmem>>, %arg5: memref<1x8x8xf32, #tpu.memory_space<vmem>>, %arg6: memref<1x32x8xf32, #tpu.memory_space<vmem>>, %arg7: memref<1x32x8xf32, #tpu.memory_space<vmem>>, %arg8: memref<1x32x8xf32, #tpu.memory_space<vmem>>, %arg9: memref<1x8x32xf32, #tpu.memory_space<vmem>>, %arg10: memref<1x8x32xf32, #tpu.memory_space<vmem>>, %arg11: memref<8x32xf32, #tpu.memory_space<vmem>>) attributes {dimension_semantics = [#tpu.dimension_semantics<parallel>, #tpu.dimension_semantics<arbitrary>], iteration_bounds = array<i64: 2, 4>, scalar_prefetch = 0 : i64, scratch_operands = 1 : i64, tpu.core_type = #tpu.core_type<tc>, window_params = [{transform_indices = @transform_0, window_bounds = array<i64: 1, 8, 32>}, {transform_indices = @transform_1, window_bounds = array<i64: 1, 8, 32>}, {transform_indices = @transform_2, window_bounds = array<i64: 1, 8, 32>}, {transform_indices = @transform_3, window_bounds = array<i64: 1, 8, 8>}, {transform_indices = @transform_4, window_bounds = array<i64: 1, 32, 8>}, {transform_indices = @transform_5, window_bounds = array<i64: 1, 32, 8>}, {transform_indices = @transform_6, window_bounds = array<i64: 1, 32, 8>}, {transform_indices = @transform_7, window_bounds = array<i64: 1, 8, 32>}, {transform_indices = @transform_8, window_bounds = array<i64: 1, 8, 32>}]} {
    %c0_i32 = arith.constant 0 : i32
    %0 = arith.cmpi eq, %arg1, %c0_i32 : i32
    %1 = arith.extui %0 : i1 to i32
    %c0_i32_0 = arith.constant 0 : i32
    %2 = arith.cmpi ne, %1, %c0_i32_0 : i32
    scf.if %2 {
      %cst_39 = arith.constant 0.000000e+00 : f32
      %46 = vector.broadcast %cst_39 : f32 to vector<8x32xf32>
      %c0_40 = arith.constant 0 : index
      %c0_41 = arith.constant 0 : index
      %47 = vector.load %arg11[%c0_40, %c0_41] : memref<8x32xf32, #tpu.memory_space<vmem>>, vector<8x32xf32>
      tpu.vector_store %arg11[%c0_40, %c0_41], %46 {strides = array<i32>} : memref<8x32xf32, #tpu.memory_space<vmem>>, vector<8x32xf32>,
    } else {
    }
    %c0 = arith.constant 0 : index
    %c0_1 = arith.constant 0 : index
    %c0_2 = arith.constant 0 : index
    %3 = vector.load %arg2[%c0, %c0_1, %c0_2] : memref<1x8x32xf32, #tpu.memory_space<vmem>>, vector<1x8x32xf32>
    %4 = vector.shape_cast %3 : vector<1x8x32xf32> to vector<8x32xf32>
    %c0_3 = arith.constant 0 : index
    %c0_4 = arith.constant 0 : index
    %c0_5 = arith.constant 0 : index
    %5 = vector.load %arg3[%c0_3, %c0_4, %c0_5] : memref<1x8x32xf32, #tpu.memory_space<vmem>>, vector<1x8x32xf32>
    %6 = vector.shape_cast %5 : vector<1x8x32xf32> to vector<8x32xf32>
    %c0_6 = arith.constant 0 : index
    %c0_7 = arith.constant 0 : index
    %c0_8 = arith.constant 0 : index
    %7 = vector.load %arg4[%c0_6, %c0_7, %c0_8] : memref<1x8x32xf32, #tpu.memory_space<vmem>>, vector<1x8x32xf32>
    %8 = vector.shape_cast %7 : vector<1x8x32xf32> to vector<8x32xf32>
    %c0_9 = arith.constant 0 : index
    %c0_10 = arith.constant 0 : index
    %c0_11 = arith.constant 0 : index
    %9 = vector.load %arg6[%c0_9, %c0_10, %c0_11] : memref<1x32x8xf32, #tpu.memory_space<vmem>>, vector<1x32x8xf32>
    %10 = vector.shape_cast %9 : vector<1x32x8xf32> to vector<32x8xf32>
    %c0_12 = arith.constant 0 : index
    %c0_13 = arith.constant 0 : index
    %c0_14 = arith.constant 0 : index
    %11 = vector.load %arg7[%c0_12, %c0_13, %c0_14] : memref<1x32x8xf32, #tpu.memory_space<vmem>>, vector<1x32x8xf32>
    %12 = vector.shape_cast %11 : vector<1x32x8xf32> to vector<32x8xf32>
    %c0_15 = arith.constant 0 : index
    %c0_16 = arith.constant 0 : index
    %c0_17 = arith.constant 0 : index
    %13 = vector.load %arg8[%c0_15, %c0_16, %c0_17] : memref<1x32x8xf32, #tpu.memory_space<vmem>>, vector<1x32x8xf32>
    %14 = vector.shape_cast %13 : vector<1x32x8xf32> to vector<32x8xf32>
    %c0_18 = arith.constant 0 : index
    %c0_19 = arith.constant 0 : index
    %c0_20 = arith.constant 0 : index
    %15 = vector.load %arg9[%c0_18, %c0_19, %c0_20] : memref<1x8x32xf32, #tpu.memory_space<vmem>>, vector<1x8x32xf32>
    %16 = vector.shape_cast %15 : vector<1x8x32xf32> to vector<8x32xf32>
    %cst = arith.constant dense<0.000000e+00> : vector<8x8xf32>
    %17 = tpu.matmul %4, %10, %cst {dimension_numbers = #tpu.dot_dimension_numbers<[1], [0], [0], [1], [0, 0, 1, 1], [], []>} : vector<8x32xf32>, vector<32x8xf32>, vector<8x8xf32> -> vector<8x8xf32>
    %cst_21 = arith.constant dense<0.000000e+00> : vector<8x8xf32>
    %18 = tpu.matmul %6, %12, %cst_21 {dimension_numbers = #tpu.dot_dimension_numbers<[1], [0], [0], [1], [0, 0, 1, 1], [], []>} : vector<8x32xf32>, vector<32x8xf32>, vector<8x8xf32> -> vector<8x8xf32>
    %cst_22 = arith.constant dense<0.000000e+00> : vector<8x8xf32>
    %19 = tpu.matmul %8, %14, %cst_22 {dimension_numbers = #tpu.dot_dimension_numbers<[1], [0], [0], [1], [0, 0, 1, 1], [], []>} : vector<8x32xf32>, vector<32x8xf32>, vector<8x8xf32> -> vector<8x8xf32>
    %cst_23 = arith.constant dense<0.000000e+00> : vector<8x8xf32>
    %20 = tpu.matmul %17, %18, %cst_23 {dimension_numbers = #tpu.dot_dimension_numbers<[1], [1], [0], [0], [0, 0, 1, 0], [], []>} : vector<8x8xf32>, vector<8x8xf32>, vector<8x8xf32> -> vector<8x8xf32>
    %cst_24 = arith.constant 0.353553385 : f32
    %21 = vector.broadcast %cst_24 : f32 to vector<8x8xf32>
    %22 = arith.mulf %20, %21 : vector<8x8xf32>
    %c0_25 = arith.constant 0 : index
    %c0_26 = arith.constant 0 : index
    %c0_27 = arith.constant 0 : index
    %23 = vector.load %arg5[%c0_25, %c0_26, %c0_27] : memref<1x8x8xf32, #tpu.memory_space<vmem>>, vector<1x8x8xf32>
    %24 = vector.shape_cast %23 : vector<1x8x8xf32> to vector<8x8xf32>
    %cst_28 = arith.constant 0.000000e+00 : f32
    %25 = vector.broadcast %cst_28 : f32 to vector<8x8xf32>
    %26 = arith.cmpf oeq, %24, %25 : vector<8x8xf32>
    %cst_29 = arith.constant -1.000000e+09 : f32
    %27 = vector.broadcast %cst_29 : f32 to vector<8x8xf32>
    %28 = arith.select %26, %27, %22 : vector<8x8xi1>, vector<8x8xf32>
    %cst_30 = arith.constant dense<0xFF800000> : vector<8xf32>
    %29 = vector.multi_reduction <maximumf>, %28, %cst_30 [1] : vector<8x8xf32> to vector<8xf32>
    %30 = vector.shape_cast %29 : vector<8xf32> to vector<8x1xf32>
    %31 = vector.broadcast %30 : vector<8x1xf32> to vector<8x8xf32>
    %32 = arith.subf %28, %31 : vector<8x8xf32>
    %33 = math.exp %32 : vector<8x8xf32>
    %cst_31 = arith.constant dense<0.000000e+00> : vector<8xf32>
    %34 = vector.multi_reduction <add>, %33, %cst_31 [1] : vector<8x8xf32> to vector<8xf32>
    %35 = vector.shape_cast %34 : vector<8xf32> to vector<8x1xf32>
    %36 = vector.broadcast %35 : vector<8x1xf32> to vector<8x8xf32>
    %37 = arith.divf %33, %36 : vector<8x8xf32>
    %cst_32 = arith.constant dense<0.000000e+00> : vector<8x8xf32>
    %38 = tpu.matmul %37, %19, %cst_32 {dimension_numbers = #tpu.dot_dimension_numbers<[1], [0], [0], [1], [0, 0, 1, 1], [], []>} : vector<8x8xf32>, vector<8x8xf32>, vector<8x8xf32> -> vector<8x8xf32>
    %c0_33 = arith.constant 0 : index
    %c0_34 = arith.constant 0 : index
    %39 = vector.load %arg11[%c0_33, %c0_34] : memref<8x32xf32, #tpu.memory_space<vmem>>, vector<8x32xf32>
    %cst_35 = arith.constant dense<0.000000e+00> : vector<8x32xf32>
    %40 = tpu.matmul %38, %16, %cst_35 {dimension_numbers = #tpu.dot_dimension_numbers<[1], [0], [0], [1], [0, 0, 1, 1], [], []>} : vector<8x8xf32>, vector<8x32xf32>, vector<8x32xf32> -> vector<8x32xf32>
    %41 = arith.addf %39, %40 : vector<8x32xf32>
    %c0_36 = arith.constant 0 : index
    %c0_37 = arith.constant 0 : index
    %42 = vector.load %arg11[%c0_36, %c0_37] : memref<8x32xf32, #tpu.memory_space<vmem>>, vector<8x32xf32>
    tpu.vector_store %arg11[%c0_36, %c0_37], %41 {strides = array<i32>} : memref<8x32xf32, #tpu.memory_space<vmem>>, vector<8x32xf32>,
    %c3_i32 = arith.constant 3 : i32
    %43 = arith.cmpi eq, %arg1, %c3_i32 : i32
    %44 = arith.extui %43 : i1 to i32
    %c0_i32_38 = arith.constant 0 : i32
    %45 = arith.cmpi ne, %44, %c0_i32_38 : i32
    scf.if %45 {
      %c0_39 = arith.constant 0 : index
      %c0_40 = arith.constant 0 : index
      %46 = vector.load %arg11[%c0_39, %c0_40] : memref<8x32xf32, #tpu.memory_space<vmem>>, vector<8x32xf32>
      %47 = vector.shape_cast %46 : vector<8x32xf32> to vector<1x8x32xf32>
      %c0_41 = arith.constant 0 : index
      %c0_42 = arith.constant 0 : index
      %c0_43 = arith.constant 0 : index
      %48 = vector.load %arg10[%c0_41, %c0_42, %c0_43] : memref<1x8x32xf32, #tpu.memory_space<vmem>>, vector<1x8x32xf32>
      tpu.vector_store %arg10[%c0_41, %c0_42, %c0_43], %47 {strides = array<i32>} : memref<1x8x32xf32, #tpu.memory_space<vmem>>, vector<1x8x32xf32>,
    } else {
    }
    return
  }
  func.func @transform_0(%arg0: i32, %arg1: i32) -> (i32, i32, i32) {
    %c0_i32 = arith.constant 0 : i32
    %c0_i32_0 = arith.constant 0 : i32
    %c0_i32_1 = arith.constant 0 : i32
    return %arg0, %c0_i32, %c0_i32_0 : i32, i32, i32
  }
  func.func @transform_1(%arg0: i32, %arg1: i32) -> (i32, i32, i32) {
    %c0_i32 = arith.constant 0 : i32
    %c0_i32_0 = arith.constant 0 : i32
    %c0_i32_1 = arith.constant 0 : i32
    return %arg0, %c0_i32, %c0_i32_0 : i32, i32, i32
  }
  func.func @transform_2(%arg0: i32, %arg1: i32) -> (i32, i32, i32) {
    %c0_i32 = arith.constant 0 : i32
    %c0_i32_0 = arith.constant 0 : i32
    %c0_i32_1 = arith.constant 0 : i32
    return %arg0, %c0_i32, %c0_i32_0 : i32, i32, i32
  }
  func.func @transform_3(%arg0: i32, %arg1: i32) -> (i32, i32, i32) {
    %c0_i32 = arith.constant 0 : i32
    %c0_i32_0 = arith.constant 0 : i32
    %c0_i32_1 = arith.constant 0 : i32
    return %arg0, %c0_i32, %c0_i32_0 : i32, i32, i32
  }
  func.func @transform_4(%arg0: i32, %arg1: i32) -> (i32, i32, i32) {
    %c0_i32 = arith.constant 0 : i32
    %c0_i32_0 = arith.constant 0 : i32
    %c0_i32_1 = arith.constant 0 : i32
    return %arg1, %c0_i32, %c0_i32_0 : i32, i32, i32
  }
  func.func @transform_5(%arg0: i32, %arg1: i32) -> (i32, i32, i32) {
    %c0_i32 = arith.constant 0 : i32
    %c0_i32_0 = arith.constant 0 : i32
    %c0_i32_1 = arith.constant 0 : i32
    return %arg1, %c0_i32, %c0_i32_0 : i32, i32, i32
  }
  func.func @transform_6(%arg0: i32, %arg1: i32) -> (i32, i32, i32) {
    %c0_i32 = arith.constant 0 : i32
    %c0_i32_0 = arith.constant 0 : i32
    %c0_i32_1 = arith.constant 0 : i32
    return %arg1, %c0_i32, %c0_i32_0 : i32, i32, i32
  }
  func.func @transform_7(%arg0: i32, %arg1: i32) -> (i32, i32, i32) {
    %c0_i32 = arith.constant 0 : i32
    %c0_i32_0 = arith.constant 0 : i32
    %c0_i32_1 = arith.constant 0 : i32
    return %arg1, %c0_i32, %c0_i32_0 : i32, i32, i32
  }
  func.func @transform_8(%arg0: i32, %arg1: i32) -> (i32, i32, i32) {
    %c0_i32 = arith.constant 0 : i32
    %c0_i32_0 = arith.constant 0 : i32
    %c0_i32_1 = arith.constant 0 : i32
    return %arg0, %c0_i32, %c0_i32_0 : i32, i32, i32
  }
}

</mosaic_0001>

<bundles_post_ra>
// kernel: tpu_custom_call.1
= control target key start
LH: loop header
LB: loop body
LE: loop exit
PB: predicated region body
PF: predicated region fallthrough
CT: control target
= control target key end

     0   :  { %s1258_s0 = inlined_call_operand.vmem [shape: f32[2,8,32], index: 0, kind: input, shape index: {}]   ;;  %s1259_s1 = inlined_call_operand.vmem [shape: f32[2,8,32], index: 1, kind: input, shape index: {}]   ;;  %s1260_s2 = inlined_call_operand.vmem [shape: f32[2,8,32], index: 2, kind: input, shape index: {}]   ;;  %s1261_s3 = inlined_call_operand.vmem [shape: f32[2,8,8], index: 3, kind: input, shape index: {}]   ;;  %s1262_s4 = inlined_call_operand.vmem [shape: f32[4,32,8], index: 4, kind: input, shape index: {}]   ;;  %s1263_s5 = inlined_call_operand.vmem [shape: f32[4,32,8], index: 5, kind: input, shape index: {}]   ;;  %s1264_s6 = inlined_call_operand.vmem [shape: f32[4,32,8], index: 6, kind: input, shape index: {}]   ;;  %s1265_s7 = inlined_call_operand.vmem [shape: f32[4,8,32], index: 7, kind: input, shape index: {}]   ;;  %s1266_s8 = inlined_call_operand.hbm [shape: f32[2,8,32], index: 8, kind: output, shape index: {}]  }
   0x1   :  { %1279 = sst [smem:[#allocation16_spill]] %s1259_s1 }
   0x2   :  { %1280 = sst [smem:[#allocation17_spill]] %s1266_s8 }
   0x3   :  { %13 = vsyncpa [#allocation4], 0 }
   0x4   :  { %15 = vsyncpa [#allocation4 + $0x1], 0  ;;  %s1064_s27 = smov 0   ;;  %s1066_s28 = smov 0  }
   0x5   :  { %s1068_s29 = smov 0   ;;  %s1070_s30 = smov 0  }
   0x6   :  { %s1072_s9 = smov 0   ;;  %s1074_s10 = smov 0  }
   0x7   :  { %s1076_s11 = smov 0   ;;  %s1078_s12 = smov 0  }
   0x8 LB: > { %1281 = sst [smem:[#allocation6_spill]] %s988_s27  ;;  %s813_s13 = sadd.s32 4294967295, %s1016_s12   ;;  %s1016_s12 = sphi %s1078_s12, %s21_s12   ;;  %s1012_s11 = sphi %s1076_s11, %s1306_s11   ;;  %s1008_s10 = sphi %s1074_s10, %s1305_s10   ;;  %s1004_s9 = sphi %s1072_s9, %s1304_s9   ;;  %s1000_s30 = sphi %s1070_s30, %s1303_s30   ;;  %s996_s29 = sphi %s1068_s29, %s1302_s29   ;;  %s992_s28 = sphi %s1066_s28, %s1308_s28   ;;  %s988_s27 = sphi %s1064_s27, %s1307_s27  }
   0x9   : > { %1282 = sst [smem:[#allocation7_spill]] %s996_s29  ;;  %s814_s14 = sadd.s32 4294967294, %s1016_s12  }
   0xa   : > { %1283 = sst [smem:[#allocation8_spill]] %s1008_s10  ;;  %s30_s15 = sadd.s32 1, %s1008_s10 }
   0xb   : > { %1284 = sst [smem:[#allocation9_spill]] %s1012_s11  ;;  %p31_p0 = scmp.ge.s32.totalorder %s30_s15, 4 }
   0xc   : > { %1285 = sst [smem:[#allocation10_spill]] %s1016_s12  ;;  %s33_s16 = sadd.s32 1, %s1012_s11 }
   0xd   : > { %p258_p1 = scmp.ne.s32.totalorder %s996_s29, %s992_s28  ;;  %p259_p2 = scmp.eq.s32.totalorder %s813_s13, 7 }
   0xe   : > { %s1310_s15 = smov (%p31_p0, %s30_s15), 0  ;;  %s1312_s16 = smov (!%p31_p0, %s33_s16), %s1012_s11 }
   0xf   : > { %1286 = sst [smem:[#allocation11_spill]] %s1310_s15  ;;  %p1113_p3 = por %p259_p2, %p258_p1 }
  0x10   : > { %p264_p4 = scmp.ne.s32.totalorder %s992_s28, %s988_s27  ;;  %p35_p5 = scmp.ge.s32.totalorder %s1312_s16, 2 }
  0x11   : > { %s1287_s17 = scalar_select %p1113_p3, 1, 0 }
  0x12   : > { %p265_p6 = scmp.eq.s32.totalorder %s814_s14, 7  ;;  %p817_p7 = scmp.ge.s32.totalorder %s1016_s12, 1 }
  0x13   : > { %1288 = sst [smem:[#allocation12_spill]] %s1287_s17  ;;  %p342_p8 = scmp.lt.s32.totalorder %s1016_s12, 9 }
  0x14   : > { %s1314_s16 = smov (%p35_p5, %s1312_s16), 0  ;;  %p1123_p9 = por %p265_p6, %p264_p4 }
  0x15   : > { %1289 = sst [smem:[#allocation13_spill]] %s1314_s16  ;;  %p343_p10 = pnand %p817_p7, %p342_p8 }
  0x16   : > { %s1290_s18 = scalar_select %p1123_p9, 1, 0 }
  0x17   : > { %s245_s19 = ssub.s32 %s1012_s11, %s1314_s16  ;;  %s248_s20 = sadd.s32 1, %s996_s29 }
  0x18   : > { %1291 = sst [smem:[#allocation14_spill]] %s1290_s18  ;;  %p246_p11 = scmp.eq.s32.totalorder %s245_s19, 0 }
  0x19   : > { %346 = sbr.rel (%p343_p10) target bundleno = 869 (0x365), region = 52  ;;  %s1268_s22 = sand.u32 (!%p343_p10), 1, %s992_s28  }
  0x1a   : > { %s1131_s21 = scalar_select %p246_p11, %s996_s29, %s248_s20  }
  0x1b   : > { %p406_p12 = scmp.lt.s32.totalorder (!%p343_p10), %s1004_s9, 1  ;;  %s1137_s23 = sshll.u32 (!%p343_p10), %s1268_s22, 3 }
  0x1c   : > { %1292 = sst [smem:[#allocation15_spill]] %s1131_s21  ;;  %p422_p13 = scmp.lt.s32.totalorder (!%p343_p10), %s1000_s30, 3 }
  0x1d   : > { %s1293_s1 = sld [smem:[#allocation16_spill]] (!%p343_p10)  ;;  %s405_s21 = scalar_lea.vmem (!%p343_p10), [#allocation3], %s1137_s23 }
  0x1e   : > { %s407_s24 = scalar_select %p406_p12, %s1004_s9, 1 }
  0x1f   : > { %s423_s25 = scalar_select %p422_p13, %s1000_s30, 3 }
  0x20   : > { %s1142_s26 = sshll.u32 %s407_s24, 3  ;;  %p830_p0 = scmp.ne.s32.totalorder %s1000_s30, 0 }
  0x21   : > { %s417_s10 = scalar_lea.vmem %s1260_s2, %s1142_s26  ;;  %s421_s24 = scalar_lea.vmem %s1261_s3, %s1142_s26 }
  0x22   : > { %s843_s18 = sshll.u32 %s423_s25, 5  ;;  %s829_s27 = sshll.u32 %s423_s25, 3 }
  0x23   : > { %s413_s15 = scalar_lea.vmem %s1293_s1, %s1142_s26  ;;  %s426_s14 = scalar_lea.vmem %s1262_s4, %s843_s18 }
  0x24   : > { %s431_s17 = scalar_lea.vmem %s1263_s5, %s843_s18  ;;  %s1169_s1 = scalar_lea.vmem %s1264_s6, %s843_s18 }
  0x25   : > { %s1174_s29 = scalar_lea.vmem %s1265_s7, %s829_s27  ;;  %444 = sbr.rel (%p830_p0) target bundleno = 44 (0x2c), region = 56 }
  0x2a   : > { %vm445_vm0 = vcmask 261120   ;;  %v1018_v0 = vmov 0.0  }
  0x2b   : > { %446 = vst.msk [vmem:[#allocation2] sm:$0xff] %vm445_vm0, %v1018_v0 }
  0x2c PF: > { %v457_v1 = vld [vmem:[%s431_s17 + $0x18] sm:$0xff]  ;;  %v456_v2 = vld [vmem:[%s431_s17 + $0x10] sm:$0xff]  ;;  %v455_v5 = vld [vmem:[%s431_s17 + $0x8] sm:$0xff]  ;;  %vm463_vm1 = vcmask 261120   ;;  %s1294_s12 = scalar_lea.vmem %s1258_s0, %s1142_s26  ;;  %vm533_vm2 = vcmask 64512   ;;  %p838_p1 = scmp.ne.s32.totalorder %s1000_s30, 3 }
  0x2d   : > { %v453_v3 = vld [vmem:[%s426_s14 + $0x18] sm:$0xff]  ;;  %502 = vmatpush.msra.mxu1 %v457_v1  ;;  %v452_v4 = vld [vmem:[%s426_s14 + $0x10] sm:$0xff]  ;;  %v451_v6 = vld [vmem:[%s426_s14 + $0x8] sm:$0xff] }
  0x2e   : > { %479 = vmatpush.msra.mxu0 %v453_v3  ;;  %v454_v7 = vld [vmem:[%s431_s17] sm:$0xff]  ;;  %v461_v18 = vld [vmem:[%s1169_s1 + $0x18] sm:$0xff]  ;;  %v460_v19 = vld [vmem:[%s1169_s1 + $0x10] sm:$0xff] }
  0x2f   : > { %503 = vmatpush.msra.mxu1 %v456_v2  ;;  %v450_v8 = vld [vmem:[%s426_s14] sm:$0xff]  ;;  %525 = vmatpush.msra.mxu2 %v461_v18  ;;  %v459_v20 = vld [vmem:[%s1169_s1 + $0x8] sm:$0xff] }
  0x30   : > { %480 = vmatpush.msra.mxu0 %v452_v4  ;;  %v448_v9 = vld [vmem:[%s413_s15] sm:$0xff] }
  0x31   : > { %504 = vmatpush.msra.mxu1 %v455_v5  ;;  %v447_v10 = vld [vmem:[%s1294_s12] sm:$0xff]  ;;  %526 = vmatpush.msra.mxu2 %v460_v19 }
  0x32   : > { %481 = vmatpush.msra.mxu0 %v451_v6  ;;  %v561_v13 = vld [vmem:[%s421_s24] sm:$0xff] }
  0x33   : > { %505 = vmatpush.msra.mxu1 %v454_v7  ;;  %vm562_vm3 = vcmp.eq.f32.partialorder %v561_v13, 0.0  ;;  %v458_v21 = vld [vmem:[%s1169_s1] sm:$0xff]  ;;  %527 = vmatpush.msra.mxu2 %v459_v20 }
  0x34   : > { %482 = vmatpush.msra.mxu0 %v450_v8  ;;  %832 = vmatmul.msk.f32.vlgmr.msra.gmra.mxu1 %vm463_vm1, %v448_v9  ;;  %v449_v22 = vld [vmem:[%s417_s10] sm:$0xff] }
  0x35   : > { %831 = vmatmul.msk.f32.vlgmr.msra.gmra.mxu0 %vm463_vm1, %v447_v10  ;;  %528 = vmatpush.msra.mxu2 %v458_v21  ;;  %v462_v29 = vld [vmem:[%s1174_s29] sm:$0xff] }
  0x36   : > { %833 = vmatmul.msk.f32.vlgmr.msra.gmra.mxu2 %vm463_vm1, %v449_v22  ;;  %630 = vmatpush.msrb.mxu0 %v462_v29  ;;  %v611_v43 = vld [vmem:[#allocation2] sm:$0xff] }
  0xb1   : > { %v507_v11 = vpop.f32.mrf.mxu1 }
  0xb2   : > { %834 = vmatpush.xpose.msk.msra.mxu3 %vm533_vm2, %v507_v11  ;;  %v484_v12 = vpop.f32.mrf.mxu0 }
  0xb5   : > { %835 = vmatmul.msk.f32.vlgmr.msra.gmra.mxu3 %vm533_vm2, %v484_v12 }
  0xb9   : > { %v530_v28 = vpop.f32.mrf.mxu2 }
  0xba   : > { %606 = vmatpush.msrb.mxu3 %v530_v28 }
 0x138   : > { %v557_v14 = vpop.f32.mrf.mxu3 }
 0x139   : > { %v560_v15 = vmul.f32 0.35355338, %v557_v14 }
 0x13b   : > { %v563_v16 = vsel %vm562_vm3, -1e+09, %v560_v15 }
 0x13c   : > { %v564_v17 = vsel %vm533_vm2, %v563_v16, -inf }
 0x13d   : > { %565 = vmax.xlane.f32.xlu0 %v564_v17 }
 0x1b0   : > { %v566_v23 = vpop.xlane.xlu0 %565 }
 0x1b1   : > { %v567_v24 = vsub.f32 %v563_v16, %v566_v23 }
 0x1b3   : > { %v568_v25 = vmul.f32 1.442695, %v567_v24 }
 0x1b5   : > { %918 = vpow2.f32 %v568_v25 }
 0x1bb   : > { %v919_v26 = vpop.eup %918 }
 0x1bc   : > { %v570_v27 = vsel %vm533_vm2, %v919_v26, 0.0 }
 0x1bd   : > { %571 = vadd.xlane.f32.xlu0 %v570_v27 }
 0x230   : > { %v572_v30 = vpop.xlane.xlu0 %571 }
 0x231   : > { %920 = vrcp.f32 %v572_v30  ;;  %v584_v34 = vand.u32 2147483648, %v572_v30  ;;  %v582_v36 = vand.u32 2147483647, %v572_v30  ;;  %vm578_vm5 = vweird.f32 %v572_v30 }
 0x233   : > { %v585_v38 = vor.u32 1.1754944e-38, %v584_v34  ;;  %vm583_vm7 = vcmp.eq.f32.partialorder %v582_v36, 8.507059e+37 }
 0x237   : > { %v921_v31 = vpop.eup %920 }
 0x238   : > { %v574_v32 = vmul.f32 %v921_v31, %v572_v30  ;;  %vm579_vm4 = vweird.f32 %v921_v31 }
 0x239   : > { %vm580_vm6 = vmor %vm578_vm5, %vm579_vm4 }
 0x23a   : > { %v575_v33 = vsub.f32 1.0, %v574_v32 }
 0x23c   : > { %v576_v35 = vmul.f32 %v921_v31, %v575_v33 }
 0x23e   : > { %v577_v37 = vadd.f32 %v921_v31, %v576_v35 }
 0x240   : > { %v581_v39 = vsel %vm580_vm6, %v921_v31, %v577_v37 }
 0x241   : > { %v586_v40 = vsel %vm583_vm7, %v585_v38, %v581_v39 }
 0x242   : > { %v587_v41 = vmul.f32 %v919_v26, %v586_v40 }
 0x244   : > { %836 = vmatmul.msk.f32.vlgmr.msrb.gmra.mxu3 %vm533_vm2, %v587_v41 }
 0x2c7   : > { %v608_v42 = vpop.f32.mrf.mxu3 }
 0x2c8   : > { %837 = vmatmul.msk.f32.vlgmr.msrb.gmra.mxu0 %vm533_vm2, %v608_v42 }
 0x344   : > { %640 = sbr.rel (%p838_p1) target bundleno = 849 (0x351), region = 60 }
 0x345   : > { %v632_v44 = vpop.f32.mrf.mxu0 }
 0x346   : > { %v635_v45 = vadd.f32 %v632_v44, %v611_v43 }
 0x348   : > { %636 = vst.msk [vmem:[#allocation2] sm:$0xff] %vm463_vm1, %v635_v45 }
 0x34f   : > { %v641_v46 = vld [vmem:[#allocation2] sm:$0xff] }
 0x350   : > { %642 = vst.msk [vmem:[%s405_s21] sm:$0xff] %vm463_vm1, %v641_v46 }
 0x351 PF: > { %s840_s10 = sshll.u32 %s1004_s9, 3  ;;  %s1296_s24 = sld [smem:[#allocation17_spill]] }
 0x352   : > { %s656_s14 = sshll.u32 %s405_s21, 4  ;;  %s1297_s16 = sand.u32 1, %s992_s28   ;;  %s657_s14 = int_to_ptr.vmem [resolvable:$true] %s656_s14 }
 0x353   : > { %s644_s20 = scalar_lea.sflag [#allocation4], %s1297_s16 }
 0x357   : > { %s654_s13 = scalar_lea.hbm %s1296_s24, %s840_s10  ;;  %s942_s8 = scalar_lea.hbm %s1296_s24, 16 }
 0x358   : > { %s658_s30 = sshll.u32 %s654_s13, 4  ;;  %s659_s30 = int_to_ptr.hbm [resolvable:$true] %s658_s30 }
 0x359   : > { %s936_s11 = sshra.s32 %s659_s30, 4  ;;  %s937_s11 = int_to_ptr.hbm [resolvable:$true] %s936_s11 }
 0x35a   : > { %s938_s22 = scalar_lea.hbm %s937_s11, 8  ;;  %p943_p6 = scmp.lt.s32.totalorder %s937_s11, %s1296_s24 }
 0x35b   : > { %p939_p2 = scmp.ne.s32.totalorder %s937_s11, %s938_s22  ;;  %p944_p7 = scmp.lt.s32.totalorder %s942_s8, %s938_s22 }
 0x35d   : > { %p940_p4 = pnand %p939_p2, %p1113_p3  ;;  %p945_p8 = por %p944_p7, %p943_p6 }
 0x35f   : > { %p941_p5 = pneg %p940_p4 }
 0x361   : > { %p946_p10 = pnand %p945_p8, %p941_p5 }
 0x363   : > { %949 = shalt.err (!%p946_p10)
}
 0x364   : > { %846 = dma.vmem_to_hbm [thread:$0]  (%p1113_p3), %s657_s14, 128, %s659_s30, %s644_s20  }
 0x365 PF: > { %s1298_s23 = sld [smem:[#allocation10_spill]] }
 0x366   : > { %s1299_s21 = sld [smem:[#allocation6_spill]] }
 0x36b   : > { %p852_p11 = scmp.ge.s32.totalorder %s1298_s23, 2 }
 0x36c   : > { %s670_s17 = sand.u32 1, %s1299_s21  }
 0x36d   : > { %p849_p12 = pnand %p852_p11, %p1123_p9  ;;  %s671_s18 = scalar_lea.sflag [#allocation4], %s670_s17 }
 0x36f   : > { %p850_p13 = pneg %p849_p12 }
 0x371   : > { %983 = dma.done.wait (%p850_p13), %s671_s18, 128  }
 0x372   : > { %985 = vsyncadd (%p850_p13), %s671_s18, 4294967168  ;;  %s21_s12 = sadd.s32 1, %s1298_s23   ;;  %s1301_s25 = sld [smem:[#allocation7_spill]] }
 0x373   : > { %p18_p0 = scmp.ge.s32.totalorder %s21_s12, 10   ;;  %s1302_s29 = sld [smem:[#allocation15_spill]] }
 0x374   : > { %s1303_s30 = sld [smem:[#allocation8_spill]]  ;;  %s1307_s27 = smov %s992_s28 }
 0x375   : > { %s1304_s9 = sld [smem:[#allocation9_spill]]  ;;  %20 = sbr.rel (!%p18_p0) target bundleno = 8 (0x8), region = 116 }
 0x376   : > { %s1305_s10 = sld [smem:[#allocation11_spill]] }
 0x377   : > { %s1306_s11 = sld [smem:[#allocation13_spill]] }
 0x378   : > { %s1308_s28 = smov %s1301_s25 }
 0x37a   :  { %677 = vsyncpa [#allocation4], 1 }
 0x37b   :  { %679 = vsyncpa [#allocation4 + $0x1], 1 }

</bundles_post_ra>
